<compile_context>
chip_gen: v7x
topology: tpu7x:2x2x1
jax: 0.10.0
libtpu: 0.0.40
codegen_flags: <defaults>
</compile_context>

<pallas_src>
import functools

import jax
import jax.numpy as jnp
from jax.experimental import pallas as pl
from jax.experimental.pallas import tpu as pltpu


def joint_attention_kernel(x_ref, w_ref, b_ref, o_ref):
    # x_ref: (Bt, N, D) compute dtype; w_ref: (D, D+J) compute dtype
    # b_ref: (1, D+J) f32;             o_ref: (Bt, J, D) output dtype
    Bt, N, D = x_ref.shape
    J = o_ref.shape[1]
    F = D + J

    # ---- single fused projection + score matmul (one MXU pass) -------------
    #   [ v | scores ] = x @ [ W_v^T | W_k^T @ JE^T ] + [ b_v | b_k @ JE^T ]
    # (N % 8 == 0 keeps this reshape a pure view of the (8,128)-tiled block.)
    x2d = x_ref[...].reshape(Bt * N, D)
    fused = jnp.dot(x2d, w_ref[...], preferred_element_type=jnp.float32)
    fused = fused + b_ref[...]                       # broadcast (1, F), f32
    fused = fused.reshape(Bt, N, F)

    v = fused[..., :D]                               # (Bt, N, D) f32
    scores = fused[..., D:]                          # (Bt, N, J) f32

    # ---- softmax over the token axis N (PyTorch dim=1), f32 ----------------
    m = jnp.max(scores, axis=1, keepdims=True)
    e = jnp.exp(scores - m)
    s = jnp.sum(e, axis=1, keepdims=True)
    p = e / s                                        # exact division

    # ---- out[b] = p[b]^T @ v[b] : contract N (dim 1 of both), batch dim 0 --
    out = jax.lax.dot_general(
        p, v,
        dimension_numbers=(((1,), (1,)), ((0,), (0,))),
        preferred_element_type=jnp.float32)          # (Bt, J, D)
    o_ref[...] = out.astype(o_ref.dtype)


def _pick_batch_block(B, N, D, itemsize, max_block_bytes=2 << 20):
    """Largest divisor of B whose x block fits the byte budget, preferring
    >=4 grid steps (pipelining + megacore), then >=2, then whatever fits."""
    divisors = [d for d in range(1, B + 1) if B % d == 0]
    fitting = [d for d in divisors if d * N * D * itemsize <= max_block_bytes] or [1]
    for min_steps in (4, 2, 1):
        ok = [d for d in fitting if B // d >= min_steps]
        if ok:
            return max(ok)
    return 1


@functools.partial(jax.jit, static_argnames=("batch_block", "compute_dtype"))
def joint_attention(x, joint_emb, w_kv, b_kv, *, batch_block=None,
                    compute_dtype=jnp.bfloat16):
    """JointAttention forward.

    x:         (B, N, D)
    joint_emb: (1, J, D)
    w_kv:      (2D, D)   PyTorch nn.Linear(dim, 2*dim) weight
    b_kv:      (2D,)     PyTorch nn.Linear bias
    returns    (B, J, D) in x.dtype
    """
    B, N, D = x.shape
    J = joint_emb.shape[1]
    out_dtype = x.dtype

    # ---- host-side algebraic pre-fusion (call-invariant, done in f32) ------
    w_k = w_kv[:D]                                    # (D, D)
    w_v = w_kv[D:]                                    # (D, D)
    je = joint_emb[0]                                 # (J, D)
    w_attn = w_k.T @ je.T                             # (D, J)
    b_attn = b_kv[:D] @ je.T                          # (J,)
    w_fused = jnp.concatenate([w_v.T, w_attn], axis=1)                # (D, D+J)
    b_fused = jnp.concatenate([b_kv[D:], b_attn]).reshape(1, D + J)   # (1, D+J)

    cbytes = jnp.dtype(compute_dtype).itemsize
    x_c = x.astype(compute_dtype)
    w_c = w_fused.astype(compute_dtype)
    b_c = b_fused.astype(jnp.float32)

    if batch_block is None:
        Bt = _pick_batch_block(B, N, D, cbytes)
    else:
        Bt = batch_block
    if B % Bt != 0:
        raise ValueError("batch_block must divide B")
    grid = (B // Bt,)

    # ---- per-step VMEM footprint (generous) -> explicit scoped limit -------
    f_pad = ((D + J + 127) // 128) * 128
    vmem_est = (
        2 * Bt * N * D * cbytes                          # x, double-buffered
        + 2 * Bt * J * D * jnp.dtype(out_dtype).itemsize  # out, double-buffered
        + 2 * (D * (D + J) + (D + J)) * 4                # weights + bias
        + 4 * Bt * N * f_pad * 4                         # f32 intermediates (lane-padded)
        + (2 << 20)                                      # slack
    )
    vmem_limit = int(min(64 << 20, max(32 << 20, vmem_est)))

    grid_spec = pltpu.PrefetchScalarGridSpec(
        num_scalar_prefetch=0,
        grid=grid,
        in_specs=[
            pl.BlockSpec((Bt, N, D), lambda b: (b, 0, 0)),     # x block
            pl.BlockSpec((D, D + J), lambda b: (0, 0)),        # fused weight (shared)
            pl.BlockSpec((1, D + J), lambda b: (0, 0)),        # fused bias (shared)
        ],
        out_specs=pl.BlockSpec((Bt, J, D), lambda b: (b, 0, 0)),
    )

    return pl.pallas_call(
        joint_attention_kernel,
        out_shape=jax.ShapeDtypeStruct((B, J, D), out_dtype),
        grid_spec=grid_spec,
        compiler_params=pltpu.CompilerParams(
            dimension_semantics=("parallel",),
            vmem_limit_bytes=vmem_limit),
    )(x_c, w_c, b_c)


def joint_attention_ref(x, joint_emb, w_kv, b_kv):
    """Pure-JAX f32 reference mirroring the PyTorch forward exactly."""
    B, N, D = x.shape
    kv = x @ w_kv.T + b_kv                      # nn.Linear
    k, v = kv[..., :D], kv[..., D:]
    je = jnp.broadcast_to(joint_emb, (B,) + joint_emb.shape[1:])
    attn = k @ jnp.swapaxes(je, 1, 2)           # (B, N, J)
    attn = jax.nn.softmax(attn, axis=1)         # softmax over N (dim=1)
    return jnp.swapaxes(attn, 1, 2) @ v         # (B, J, D)


def _fused_ref(x, joint_emb, w_kv, b_kv, compute_dtype):
    """Plain-JAX mirror of the kernel's fused / reduced-precision math,
    used for a tight numerical check of the bf16 fast path."""
    B, N, D = x.shape
    je = joint_emb[0]
    w_attn = w_kv[:D].T @ je.T
    b_attn = b_kv[:D] @ je.T
    w_f = jnp.concatenate([w_kv[D:].T, w_attn], axis=1).astype(compute_dtype)
    b_f = jnp.concatenate([b_kv[D:], b_attn])
    xf = x.astype(compute_dtype)
    fused = jnp.einsum('bnd,df->bnf', xf, w_f,
                       preferred_element_type=jnp.float32) + b_f
    v, scores = fused[..., :D], fused[..., D:]
    p = jax.nn.softmax(scores, axis=1)
    out = jnp.einsum('bnj,bnd->bjd', p, v, preferred_element_type=jnp.float32)
    return out.astype(x.dtype)


if __name__ == "__main__":
    # num_joints=13, dim=64 (module defaults); small token count / batch.
    B, N, D, J = 2, 16, 64, 13

    key = jax.random.PRNGKey(0)
    kx, kje, kw, kb = jax.random.split(key, 4)

    x = jax.random.normal(kx, (B, N, D), dtype=jnp.float32)
    joint_emb = jax.random.normal(kje, (1, J, D), dtype=jnp.float32)

    # to_kv = nn.Linear(D, 2D): weight (2D, D), bias (2D,)
    w_kv = jax.random.normal(kw, (2 * D, D), dtype=jnp.float32) * (1.0 / jnp.sqrt(D))
    b_kv = jax.random.normal(kb, (2 * D,), dtype=jnp.float32) * 0.01

    ref = joint_attention_ref(x, joint_emb, w_kv, b_kv)

    # (1) f32 compute path: tight check of the algebraic re-fusion + kernel plumbing
    #     against the exact PyTorch-equivalent reference.
    out_f32 = jax.block_until_ready(
        joint_attention(x, joint_emb, w_kv, b_kv, compute_dtype=jnp.float32))
    assert out_f32.shape == (B, J, D)
    assert jnp.allclose(out_f32, ref, atol=2e-3, rtol=2e-3), "f32 path mismatch vs reference"

    # (2) default bf16 fast path: tight check against the same fused math in plain JAX
    #     (bf16 vs f32 deviation is expected and bounded; semantics validated above).
    out = jax.block_until_ready(joint_attention(x, joint_emb, w_kv, b_kv))
    assert out.shape == (B, J, D)
    ref_bf16 = _fused_ref(x, joint_emb, w_kv, b_kv, jnp.bfloat16)
    assert jnp.allclose(out, ref_bf16, atol=2e-3, rtol=2e-3), "bf16 path mismatch vs fused reference"

    print("KERNEL_OK")
</pallas_src>

<mosaic_0001>
module attributes {stable_mosaic.version = 11 : i64} {
  func.func @joint_attention_kernel(%arg0: i32, %arg1: memref<1x16x64xf32, #tpu.memory_space<vmem>>, %arg2: memref<64x77xf32, #tpu.memory_space<vmem>>, %arg3: memref<1x77xf32, #tpu.memory_space<vmem>>, %arg4: memref<1x13x64xf32, #tpu.memory_space<vmem>>) attributes {dimension_semantics = [#tpu.dimension_semantics<parallel>], iteration_bounds = array<i64: 2>, scalar_prefetch = 0 : i64, scratch_operands = 0 : i64, tpu.core_type = #tpu.core_type<tc>, window_params = [{transform_indices = @transform_0, window_bounds = array<i64: 1, 16, 64>}, {pipeline_mode = #tpu.pipeline_mode<synchronous>, transform_indices = @transform_1, window_bounds = array<i64: 64, 77>}, {pipeline_mode = #tpu.pipeline_mode<synchronous>, transform_indices = @transform_2, window_bounds = array<i64: 1, 77>}, {transform_indices = @transform_3, window_bounds = array<i64: 1, 13, 64>}]} {
    %c0 = arith.constant 0 : index
    %c0_0 = arith.constant 0 : index
    %c0_1 = arith.constant 0 : index
    %0 = vector.load %arg1[%c0, %c0_0, %c0_1] : memref<1x16x64xf32, #tpu.memory_space<vmem>>, vector<1x16x64xf32>
    %1 = vector.shape_cast %0 : vector<1x16x64xf32> to vector<16x64xf32>
    %c0_2 = arith.constant 0 : index
    %c0_3 = arith.constant 0 : index
    %2 = vector.load %arg2[%c0_2, %c0_3] : memref<64x77xf32, #tpu.memory_space<vmem>>, vector<64x77xf32>
    %cst = arith.constant dense<0.000000e+00> : vector<16x77xf32>
    %3 = tpu.matmul %1, %2, %cst {dimension_numbers = #tpu.dot_dimension_numbers<[1], [0], [0], [1], [0, 0, 1, 1], [], []>} : vector<16x64xf32>, vector<64x77xf32>, vector<16x77xf32> -> vector<16x77xf32>
    %c0_4 = arith.constant 0 : index
    %c0_5 = arith.constant 0 : index
    %4 = vector.load %arg3[%c0_4, %c0_5] : memref<1x77xf32, #tpu.memory_space<vmem>>, vector<1x77xf32>
    %5 = vector.broadcast %4 : vector<1x77xf32> to vector<16x77xf32>
    %6 = arith.addf %3, %5 : vector<16x77xf32>
    %7 = vector.shape_cast %6 : vector<16x77xf32> to vector<1x16x77xf32>
    %8 = vector.extract_strided_slice %7 {offsets = [0, 0, 0], sizes = [1, 16, 64], strides = [1, 1, 1]} : vector<1x16x77xf32> to vector<1x16x64xf32>
    %9 = vector.extract_strided_slice %7 {offsets = [0, 0, 64], sizes = [1, 16, 13], strides = [1, 1, 1]} : vector<1x16x77xf32> to vector<1x16x13xf32>
    %cst_6 = arith.constant dense<0xFF800000> : vector<1x13xf32>
    %10 = vector.multi_reduction <maximumf>, %9, %cst_6 [1] : vector<1x16x13xf32> to vector<1x13xf32>
    %11 = vector.shape_cast %10 : vector<1x13xf32> to vector<1x1x13xf32>
    %12 = vector.broadcast %11 : vector<1x1x13xf32> to vector<1x16x13xf32>
    %13 = arith.subf %9, %12 : vector<1x16x13xf32>
    %14 = math.exp %13 : vector<1x16x13xf32>
    %cst_7 = arith.constant dense<0.000000e+00> : vector<1x13xf32>
    %15 = vector.multi_reduction <add>, %14, %cst_7 [1] : vector<1x16x13xf32> to vector<1x13xf32>
    %16 = vector.shape_cast %15 : vector<1x13xf32> to vector<1x1x13xf32>
    %17 = vector.broadcast %16 : vector<1x1x13xf32> to vector<1x16x13xf32>
    %18 = arith.divf %14, %17 : vector<1x16x13xf32>
    %cst_8 = arith.constant dense<0.000000e+00> : vector<1x13x64xf32>
    %19 = tpu.matmul %18, %8, %cst_8 {dimension_numbers = #tpu.dot_dimension_numbers<[1], [1], [2], [2], [0, 0, 0, 2, 1, 2], [0], [0]>} : vector<1x16x13xf32>, vector<1x16x64xf32>, vector<1x13x64xf32> -> vector<1x13x64xf32>
    %c0_9 = arith.constant 0 : index
    %c0_10 = arith.constant 0 : index
    %c0_11 = arith.constant 0 : index
    %20 = vector.load %arg4[%c0_9, %c0_10, %c0_11] : memref<1x13x64xf32, #tpu.memory_space<vmem>>, vector<1x13x64xf32>
    tpu.vector_store %arg4[%c0_9, %c0_10, %c0_11], %19 {strides = array<i32>} : memref<1x13x64xf32, #tpu.memory_space<vmem>>, vector<1x13x64xf32>,
    return
  }
  func.func @transform_0(%arg0: i32) -> (i32, i32, i32) {
    %c0_i32 = arith.constant 0 : i32
    %c0_i32_0 = arith.constant 0 : i32
    %c0_i32_1 = arith.constant 0 : i32
    return %arg0, %c0_i32, %c0_i32_0 : i32, i32, i32
  }
  func.func @transform_1(%arg0: i32) -> (i32, i32) {
    %c0_i32 = arith.constant 0 : i32
    %c0_i32_0 = arith.constant 0 : i32
    %c0_i32_1 = arith.constant 0 : i32
    return %c0_i32, %c0_i32_0 : i32, i32
  }
  func.func @transform_2(%arg0: i32) -> (i32, i32) {
    %c0_i32 = arith.constant 0 : i32
    %c0_i32_0 = arith.constant 0 : i32
    %c0_i32_1 = arith.constant 0 : i32
    return %c0_i32, %c0_i32_0 : i32, i32
  }
  func.func @transform_3(%arg0: i32) -> (i32, i32, i32) {
    %c0_i32 = arith.constant 0 : i32
    %c0_i32_0 = arith.constant 0 : i32
    %c0_i32_1 = arith.constant 0 : i32
    return %arg0, %c0_i32, %c0_i32_0 : i32, i32, i32
  }
}

</mosaic_0001>

<bundles_post_ra>
// kernel: joint_attention.1
= control target key start
LH: loop header
LB: loop body
LE: loop exit
PB: predicated region body
PF: predicated region fallthrough
CT: control target
= control target key end

     0   :  { %s601_s12 = smov 0   ;;  %s659_s0 = inlined_call_operand.vmem [shape: f32[2,16,64], index: 0, kind: input, shape index: {}]   ;;  %s660_s1 = inlined_call_operand.vmem [shape: f32[64,77], index: 1, kind: input, shape index: {}]   ;;  %s661_s2 = inlined_call_operand.vmem [shape: f32[1,77], index: 2, kind: input, shape index: {}]   ;;  %s662_s3 = inlined_call_operand.vmem [shape: f32[2,13,64], index: 3, kind: output, shape index: {}]  }
   0x1 LB: > { %s478_s13 = sadd.s32 4294967295, %s578_s12   ;;  %p482_p0 = scmp.ge.s32.totalorder %s578_s12, 1  ;;  %s578_s12 = sphi %s601_s12, %s13_s12  }
   0x2   : > { %p137_p1 = scmp.lt.s32.totalorder %s578_s12, 3 }
   0x4   : > { %p138_p2 = pnand %p482_p0, %p137_p1 }
   0x5   : > { %v173_v0 = vld [vmem:[%s660_s1] sm:$0xff] (!%p138_p2)  ;;  %v174_v1 = vld [vmem:[%s660_s1 + $0x8] sm:$0xff] (!%p138_p2)  ;;  %v175_v2 = vld [vmem:[%s660_s1 + $0x10] sm:$0xff] (!%p138_p2)  ;;  %p161_p3 = scmp.lt.s32.totalorder (!%p138_p2), %s478_s13, 1  ;;  %vm188_vm0 = vcmask (!%p138_p2), 523264   ;;  %vm270_vm1 = vcmask (!%p138_p2), 630272  }
   0x6   : > { %141 = sbr.rel (%p138_p2) target bundleno = 760 (0x2f8), region = 32  ;;  %v536_v3 = vpack.c.bf16 (!%p138_p2), %v174_v1, %v173_v0  ;;  %v176_v4 = vld [vmem:[%s660_s1 + $0x18] sm:$0xff] (!%p138_p2)  ;;  %v177_v6 = vld [vmem:[%s660_s1 + $0x20] sm:$0xff] (!%p138_p2)  ;;  %v178_v7 = vld [vmem:[%s660_s1 + $0x28] sm:$0xff] (!%p138_p2)  ;;  %s580_s9 = smov (!%p138_p2), 64   ;;  %vm338_vm2 = vcmask (!%p138_p2), 130048  }
   0x7   : > { %v540_v5 = vpack.c.bf16 (!%p138_p2), %v176_v4, %v175_v2  ;;  %v544_v8 = vpack.c.bf16 (!%p138_p2), %v178_v7, %v177_v6  ;;  %v179_v9 = vld [vmem:[%s660_s1 + $0x30] sm:$0xff] (!%p138_p2)  ;;  %v180_v10 = vld [vmem:[%s660_s1 + $0x38] sm:$0xff] (!%p138_p2)  ;;  %v487_v14 = vld [vmem:[%s661_s2] ss:$0 sm:$0xff] (!%p138_p2)  ;;  %vm421_vm3 = vcmask (!%p138_p2), 520192  }
   0x8   : > { %537 = vmatprep.subr.bf16.mxu0 (!%p138_p2), %v536_v3  ;;  %v548_v12 = vpack.c.bf16 (!%p138_p2), %v180_v10, %v179_v9 }
   0x9   : > { %539 = vmatpush3.bf16.msra.mxu0 (!%p138_p2), %v536_v3 }
   0xa   : > { %541 = vmatprep.subr.bf16.mxu0 (!%p138_p2), %v540_v5 }
   0xd   : > { %s664_s13 = smov (!%p161_p3, %s478_s13), 1  ;;  %543 = vmatpush3.bf16.msra.mxu0 %v540_v5 }
   0xe   : > { %s494_s26 = sshll.u32 %s664_s13, 4  ;;  %545 = vmatprep.subr.bf16.mxu0 %v544_v8 }
   0xf   : > { %s165_s29 = scalar_lea.vmem %s659_s0, %s494_s26  ;;  %s170_s14 = scalar_lea.vmem %s662_s3, %s494_s26 }
  0x10   : > { %v171_v11 = vld [vmem:[%s165_s29] sm:$0xff]  ;;  %v172_v13 = vld [vmem:[%s165_s29 + $0x8] sm:$0xff] }
  0x11   : > { %526 = vmatprep.mubr.msk.f32.mxu0 %vm188_vm0, %v171_v11  ;;  %547 = vmatpush3.bf16.msra.mxu0 %v544_v8 }
  0x12   : > { %549 = vmatprep.subr.bf16.mxu0 %v548_v12 }
  0x15   : > { %551 = vmatpush3.bf16.msra.mxu0 %v548_v12 }
  0x18   : > { %527 = vmatmul.mubr.msk.f32.vlgmr.msra.gmra.mrb[0].mxu0 %vm188_vm0, %v172_v13 }
  0xeb   : > { %v528_v15 = vpop.f32.mrb[0].mxu0 }
  0xec   : > { %v267_v16 = vadd.f32 %v528_v15, %v487_v14  ;;  %v261_v17 = vpop.f32.mrb[1].mxu0 }
  0xed   : > { %v262_v18 = vadd.f32 %v487_v14, %v261_v17 }
  0xee   : > { %v272_v19 = vsel %vm270_vm1, %v267_v16, -inf }
  0xef   : > { %v271_v20 = vsel %vm270_vm1, %v262_v18, -inf  ;;  %v552_v21 = vpack.c.bf16 %v267_v16, %v262_v18 }
  0xf0   : > { %v273_v22 = vmax.f32 %v271_v20, %v272_v19 }
  0xf1   : > { %553 = vmatprep.subr.bf16.mxu1 %v552_v21 }
  0xf2   : > { %v274_v23 = vrot.slane %v273_v22, 4  ;;  %555 = vmatpush3.bf16.msra.mxu1 %v552_v21 }
  0xf4   : > { %v275_v24 = vmax.f32 %v273_v22, %v274_v23 }
  0xf6   : > { %v276_v25 = vrot.slane %v275_v24, 2 }
  0xf8   : > { %v277_v26 = vmax.f32 %v275_v24, %v276_v25 }
  0xfa   : > { %v278_v27 = vrot.slane %v277_v26, 1 }
  0xfc   : > { %v279_v28 = vmax.f32 %v277_v26, %v278_v27 }
  0xfe   : > { %v280_v29 = vsub.f32 %v262_v18, %v279_v28  ;;  %v281_v30 = vsub.f32 %v267_v16, %v279_v28 }
 0x100   : > { %v282_v31 = vmul.f32 1.442695, %v280_v29  ;;  %v284_v32 = vmul.f32 1.442695, %v281_v30 }
 0x102   : > { %566 = vpow2.f32 %v282_v31 }
 0x103   : > { %568 = vpow2.f32 %v284_v32 }
 0x10c   : > { %v567_v33 = vpop.eup %566 }
 0x10d   : > { %v569_v34 = vpop.eup %568  ;;  %v286_v35 = vsel %vm270_vm1, %v567_v33, 0.0 }
 0x10e   : > { %v287_v36 = vsel %vm270_vm1, %v569_v34, 0.0 }
 0x10f   : > { %v288_v37 = vadd.f32 %v287_v36, %v286_v35 }
 0x111   : > { %v289_v38 = vrot.slane %v288_v37, 4 }
 0x113   : > { %v290_v39 = vadd.f32 %v289_v38, %v288_v37 }
 0x115   : > { %v291_v40 = vrot.slane %v290_v39, 2 }
 0x117   : > { %v292_v41 = vadd.f32 %v291_v40, %v290_v39 }
 0x119   : > { %v293_v42 = vrot.slane %v292_v41, 1 }
 0x11b   : > { %v294_v43 = vadd.f32 %v293_v42, %v292_v41 }
 0x11d   : > { %570 = vrcp.f32 %v294_v43 }
 0x127   : > { %v571_v44 = vpop.eup %570 }
 0x128   : > { %v296_v45 = vmul.f32 %v571_v44, %v567_v33  ;;  %v297_v46 = vmul.f32 %v571_v44, %v569_v34 }
 0x12a   : > { %300 = vrot.lane.b32.xlu0 %v296_v45, %s580_s9 }
 0x12e   : > { %302 = vrot.lane.b32.xlu0 %v297_v46, %s580_s9 }
 0x19c   : > { %v301_v47 = vpop.permute.xlu0 %300 }
 0x19d   : > { %306 = vxpose.xlu1.b32.start [1/2] (short) (narrow) %v301_v47, 16 }
 0x1a0   : > { %v303_v48 = vpop.permute.xlu0 %302 }
 0x1a1   : > { %307 = vxpose.xlu1.b32.end [2/2] (short) (narrow) %v303_v48, 16 }
 0x21d   : > { %v322_v49 = vpop.trf.xlu1 }
 0x21e   : > { %533 = vmatprep.mubr.msk.f32.mxu1 %vm338_vm2, %v322_v49 }
 0x221   : > { %v323_v50 = vpop.trf.xlu1 }
 0x222   : > { %534 = vmatmul.mubr.msk.f32.vlgmr.msra.gmra.mrb[0].mxu1 %vm338_vm2, %v323_v50 }
 0x2f5   : > { %v535_v51 = vpop.f32.mrb[0].mxu1 }
 0x2f6   : > { %422 = vst.msk [vmem:[%s170_s14 + $0x8] sm:$0x1f] %vm421_vm3, %v535_v51  ;;  %v411_v52 = vpop.f32.mrb[1].mxu1 }
 0x2f7   : > { %420 = vst.msk [vmem:[%s170_s14] sm:$0xff] %vm188_vm0, %v411_v52 }
 0x2f8 PF: > { %s13_s12 = sadd.s32 1, %s578_s12  }
 0x2f9   : > { %p10_p4 = scmp.ge.s32.totalorder %s13_s12, 4  }
 0x2fb   :  { %12 = sbr.rel (!%p10_p4) target bundleno = 1 (0x1), region = 62 }

</bundles_post_ra>
